<compile_context>
chip_gen: v7x
topology: tpu7x:2x2x1
jax: 0.10.0
libtpu: 0.0.40
codegen_flags: <defaults>
</compile_context>

<pallas_src>
import numpy as np
import jax
import jax.numpy as jnp
from jax.experimental import pallas as pl
from jax.experimental.pallas import tpu as pltpu

# ---- module hyperparameters (from the PyTorch source) ----
N_EMBD = 60
NUM_HEADS = 4
HEAD_SIZE = N_EMBD // NUM_HEADS      # 15
CP = 128                             # packed / lane-padded width (one lane tile)


def _mha_kernel(x_ref, wqkv_ref, bqkv_ref, wp_ref, bp_ref, bias_ref, o_ref):
    """Single grid step: the whole batch folded into M = B*T rows.

    x_ref    : (B, T, CP)   lane-padded input
    wqkv_ref : (CP, 3*CP)   packed q|k|v weights (all heads share one 128-lane
                            slot; query weights pre-scaled by head_size**-0.5)
    bqkv_ref : (1, 3*CP)    packed q|k|v bias (query bias pre-scaled)
    wp_ref   : (CP, CP)     padded output projection weights
    bp_ref   : (1, CP)      padded output projection bias
    bias_ref : (M, M)       additive block-diagonal causal bias (0 / -inf)
    o_ref    : (B, T, CP)   lane-padded output
    """
    B, T, _ = x_ref.shape
    M = B * T
    H, hs = NUM_HEADS, HEAD_SIZE

    x = x_ref[...].reshape(M, CP)          # sublane-merge only; lane dim untouched

    # One fused MXU push for all of q, k, v: (M,128) @ (128,384).
    qkv = jnp.dot(x, wqkv_ref[...], preferred_element_type=jnp.float32) + bqkv_ref[...]
    q = qkv[:, 0 * CP:1 * CP]              # lane-aligned 128-wide slices
    k = qkv[:, 1 * CP:2 * CP]
    v = qkv[:, 2 * CP:3 * CP]

    causal_bias = bias_ref[...]            # (M, M), trace-time constant

    # Per-head lane masks over the packed 128-lane slot (head h owns lanes
    # [h*hs, (h+1)*hs)).  One iota + cheap VPU compares/selects.
    lane = jax.lax.broadcasted_iota(jnp.int32, (1, CP), 1)

    ctx = jnp.zeros((M, CP), jnp.float32)
    for h in range(H):                     # static, unrolled head loop
        head_mask = (lane >= h * hs) & (lane < (h + 1) * hs)      # (1, CP)
        q_h = jnp.where(head_mask, q, 0.0)                        # zero other heads' lanes

        # q_h @ k^T without a transpose: contract dim 1 of both.  q_h is zero
        # outside head-h lanes, so the packed k needs no masking.
        wei = jax.lax.dot_general(q_h, k, (((1,), (1,)), ((), ())),
                                  preferred_element_type=jnp.float32)   # (M, M)
        wei = wei + causal_bias
        wei = wei - jnp.max(wei, axis=-1, keepdims=True)
        ew = jnp.exp(wei)
        p = ew * pl.reciprocal(jnp.sum(ew, axis=-1, keepdims=True))     # exact recip

        head_ctx = jnp.dot(p, v, preferred_element_type=jnp.float32)    # (M, CP)
        # Keep only head h's lanes; disjoint masks rebuild the packed
        # concat(heads) layout with no lane-misaligned concatenate.
        ctx = jnp.where(head_mask, head_ctx, ctx)

    # Single output projection for all heads: (M,128) @ (128,128).
    y = jnp.dot(ctx, wp_ref[...], preferred_element_type=jnp.float32) + bp_ref[...]
    o_ref[...] = y.reshape(B, T, CP).astype(o_ref.dtype)


def prepare_mha_params(wq, bq, wk, bk, wv, bv, wp, bp):
    """One-time parameter packing (hoisted out of the per-call path).

    All heads of q (and of k, of v) share a single 128-lane slot, so the fused
    slab is (128, 3*128).  The attention scale is folded into the query
    weights/bias here, at zero in-kernel cost.
    """
    C = N_EMBD
    scale = jnp.float32(HEAD_SIZE) ** -0.5

    def pad_w(w):   # (C, C) -> (CP, CP)
        return jnp.pad(w.astype(jnp.float32), ((0, CP - C), (0, CP - C)))

    def pad_b(b):   # (1, C) -> (1, CP)
        return jnp.pad(b.astype(jnp.float32), ((0, 0), (0, CP - C)))

    wqkv = jnp.concatenate([pad_w(wq * scale), pad_w(wk), pad_w(wv)], axis=1)  # (CP, 3CP)
    bqkv = jnp.concatenate([pad_b(bq * scale), pad_b(bk), pad_b(bv)], axis=1)  # (1, 3CP)
    wp_pad = pad_w(wp)                                                         # (CP, CP)
    bp_pad = pad_b(bp)                                                         # (1, CP)
    return wqkv, bqkv, wp_pad, bp_pad


@jax.jit
def multi_head_attention(x, wqkv, bqkv, wp_pad, bp_pad):
    """Forward pass.  Takes the pre-packed parameter slabs from prepare_mha_params."""
    B, T, C = x.shape
    assert C == N_EMBD
    M = B * T

    # Block-diagonal causal mask as an additive bias, built at trace time with
    # numpy (B, T static) -> becomes a jit constant, zero per-call cost.
    row = np.arange(M)[:, None]
    col = np.arange(M)[None, :]
    allowed = (row // T == col // T) & (row >= col)
    causal_bias = jnp.asarray(np.where(allowed, 0.0, -np.inf), dtype=jnp.float32)

    # Lane-dense activations: pad C 60 -> 128, slice the real channels outside.
    x_pad = jnp.pad(x, ((0, 0), (0, 0), (0, CP - C)))

    out_pad = pl.pallas_call(
        _mha_kernel,
        out_shape=jax.ShapeDtypeStruct((B, T, CP), jnp.float32),
        grid=(1,),                                               # whole batch in one step
        in_specs=[
            pl.BlockSpec((B, T, CP), lambda i: (0, 0, 0)),       # x tile
            pl.BlockSpec((CP, 3 * CP), lambda i: (0, 0)),        # packed qkv weights
            pl.BlockSpec((1, 3 * CP), lambda i: (0, 0)),         # packed qkv bias
            pl.BlockSpec((CP, CP), lambda i: (0, 0)),            # proj weights
            pl.BlockSpec((1, CP), lambda i: (0, 0)),             # proj bias
            pl.BlockSpec((M, M), lambda i: (0, 0)),              # causal bias constant
        ],
        out_specs=pl.BlockSpec((B, T, CP), lambda i: (0, 0, 0)),
        compiler_params=pltpu.CompilerParams(
            dimension_semantics=("arbitrary",)),
    )(x_pad, wqkv, bqkv, wp_pad, bp_pad, causal_bias)

    return out_pad[:, :, :C]


def _reference(x, wq, bq, wk, bk, wv, bv, wp, bp):
    """Pure-JAX reference mirroring the PyTorch forward (eval mode)."""
    B, T, C = x.shape
    q = x @ wq + bq[0]
    k = x @ wk + bk[0]
    v = x @ wv + bv[0]
    q = q.reshape(B, T, NUM_HEADS, HEAD_SIZE)
    k = k.reshape(B, T, NUM_HEADS, HEAD_SIZE)
    v = v.reshape(B, T, NUM_HEADS, HEAD_SIZE)
    wei = jnp.einsum('bthd,bshd->bhts', q, k) * HEAD_SIZE ** -0.5
    mask = jnp.tril(jnp.ones((T, T), bool))
    wei = jnp.where(mask[None, None], wei, -jnp.inf)
    wei = jax.nn.softmax(wei, axis=-1)
    out = jnp.einsum('bhts,bshd->bthd', wei, v).reshape(B, T, C)
    return out @ wp + bp[0]


if __name__ == "__main__":
    B, T, C = 2, 8, N_EMBD

    key = jax.random.PRNGKey(0)
    ks = jax.random.split(key, 10)
    scale = 1.0 / jnp.sqrt(jnp.float32(C))
    x  = jax.random.normal(ks[0], (B, T, C), jnp.float32)
    wq = jax.random.normal(ks[1], (C, C), jnp.float32) * scale
    bq = jax.random.normal(ks[2], (1, C), jnp.float32) * 0.1
    wk = jax.random.normal(ks[3], (C, C), jnp.float32) * scale
    bk = jax.random.normal(ks[4], (1, C), jnp.float32) * 0.1
    wv = jax.random.normal(ks[5], (C, C), jnp.float32) * scale
    bv = jax.random.normal(ks[6], (1, C), jnp.float32) * 0.1
    wp = jax.random.normal(ks[7], (C, C), jnp.float32) * scale
    bp = jax.random.normal(ks[8], (1, C), jnp.float32) * 0.1

    # One-time parameter packing (not part of the per-call path).
    packed = prepare_mha_params(wq, bq, wk, bk, wv, bv, wp, bp)
    packed = jax.block_until_ready(packed)

    out = multi_head_attention(x, *packed)
    out = jax.block_until_ready(out)

    ref = _reference(x, wq, bq, wk, bk, wv, bv, wp, bp)
    assert out.shape == (B, T, C)
    assert jnp.allclose(out, ref, atol=1e-4, rtol=1e-4), "mismatch vs JAX reference"

    print("KERNEL_OK")
</pallas_src>

<mosaic_0001>
module attributes {stable_mosaic.version = 11 : i64} {
  func.func @_mha_kernel(%arg0: i32, %arg1: memref<2x8x128xf32, #tpu.memory_space<vmem>>, %arg2: memref<128x384xf32, #tpu.memory_space<vmem>>, %arg3: memref<1x384xf32, #tpu.memory_space<vmem>>, %arg4: memref<128x128xf32, #tpu.memory_space<vmem>>, %arg5: memref<1x128xf32, #tpu.memory_space<vmem>>, %arg6: memref<16x16xf32, #tpu.memory_space<vmem>>, %arg7: memref<2x8x128xf32, #tpu.memory_space<vmem>>) attributes {dimension_semantics = [#tpu.dimension_semantics<arbitrary>], iteration_bounds = array<i64: 1>, scalar_prefetch = 0 : i64, scratch_operands = 0 : i64, tpu.core_type = #tpu.core_type<tc>, window_params = [{pipeline_mode = #tpu.pipeline_mode<synchronous>, transform_indices = @transform_0, window_bounds = array<i64: 2, 8, 128>}, {pipeline_mode = #tpu.pipeline_mode<synchronous>, transform_indices = @transform_1, window_bounds = array<i64: 128, 384>}, {pipeline_mode = #tpu.pipeline_mode<synchronous>, transform_indices = @transform_2, window_bounds = array<i64: 1, 384>}, {pipeline_mode = #tpu.pipeline_mode<synchronous>, transform_indices = @transform_3, window_bounds = array<i64: 128, 128>}, {pipeline_mode = #tpu.pipeline_mode<synchronous>, transform_indices = @transform_4, window_bounds = array<i64: 1, 128>}, {pipeline_mode = #tpu.pipeline_mode<synchronous>, transform_indices = @transform_5, window_bounds = array<i64: 16, 16>}, {pipeline_mode = #tpu.pipeline_mode<synchronous>, transform_indices = @transform_6, window_bounds = array<i64: 2, 8, 128>}]} {
    %c0 = arith.constant 0 : index
    %c0_0 = arith.constant 0 : index
    %c0_1 = arith.constant 0 : index
    %0 = vector.load %arg1[%c0, %c0_0, %c0_1] : memref<2x8x128xf32, #tpu.memory_space<vmem>>, vector<2x8x128xf32>
    %1 = vector.shape_cast %0 : vector<2x8x128xf32> to vector<16x128xf32>
    %c0_2 = arith.constant 0 : index
    %c0_3 = arith.constant 0 : index
    %2 = vector.load %arg2[%c0_2, %c0_3] : memref<128x384xf32, #tpu.memory_space<vmem>>, vector<128x384xf32>
    %cst = arith.constant dense<0.000000e+00> : vector<16x384xf32>
    %3 = tpu.matmul %1, %2, %cst {dimension_numbers = #tpu.dot_dimension_numbers<[1], [0], [0], [1], [0, 0, 1, 1], [], []>} : vector<16x128xf32>, vector<128x384xf32>, vector<16x384xf32> -> vector<16x384xf32>
    %c0_4 = arith.constant 0 : index
    %c0_5 = arith.constant 0 : index
    %4 = vector.load %arg3[%c0_4, %c0_5] : memref<1x384xf32, #tpu.memory_space<vmem>>, vector<1x384xf32>
    %5 = vector.broadcast %4 : vector<1x384xf32> to vector<16x384xf32>
    %6 = arith.addf %3, %5 : vector<16x384xf32>
    %7 = vector.extract_strided_slice %6 {offsets = [0, 0], sizes = [16, 128], strides = [1, 1]} : vector<16x384xf32> to vector<16x128xf32>
    %8 = vector.extract_strided_slice %6 {offsets = [0, 128], sizes = [16, 128], strides = [1, 1]} : vector<16x384xf32> to vector<16x128xf32>
    %9 = vector.extract_strided_slice %6 {offsets = [0, 256], sizes = [16, 128], strides = [1, 1]} : vector<16x384xf32> to vector<16x128xf32>
    %c0_6 = arith.constant 0 : index
    %c0_7 = arith.constant 0 : index
    %10 = vector.load %arg6[%c0_6, %c0_7] : memref<16x16xf32, #tpu.memory_space<vmem>>, vector<16x16xf32>
    %11 = tpu.iota {dimensions = array<i32: 1>} : vector<1x128xi32>
    %cst_8 = arith.constant 0.000000e+00 : f32
    %12 = vector.broadcast %cst_8 : f32 to vector<16x128xf32>
    %c0_i32 = arith.constant 0 : i32
    %13 = vector.broadcast %c0_i32 : i32 to vector<1x128xi32>
    %14 = arith.cmpi sge, %11, %13 : vector<1x128xi32>
    %c15_i32 = arith.constant 15 : i32
    %15 = vector.broadcast %c15_i32 : i32 to vector<1x128xi32>
    %16 = arith.cmpi slt, %11, %15 : vector<1x128xi32>
    %17 = arith.andi %14, %16 : vector<1x128xi1>
    %cst_9 = arith.constant 0.000000e+00 : f32
    %18 = vector.shape_cast %17 : vector<1x128xi1> to vector<1x128xi1>
    %19 = vector.broadcast %18 : vector<1x128xi1> to vector<16x128xi1>
    %20 = vector.broadcast %cst_9 : f32 to vector<16x128xf32>
    %21 = arith.select %19, %7, %20 : vector<16x128xi1>, vector<16x128xf32>
    %cst_10 = arith.constant dense<0.000000e+00> : vector<16x16xf32>
    %22 = tpu.matmul %21, %8, %cst_10 {dimension_numbers = #tpu.dot_dimension_numbers<[1], [1], [0], [0], [0, 0, 1, 0], [], []>} : vector<16x128xf32>, vector<16x128xf32>, vector<16x16xf32> -> vector<16x16xf32>
    %23 = arith.addf %22, %10 : vector<16x16xf32>
    %cst_11 = arith.constant dense<0xFF800000> : vector<16xf32>
    %24 = vector.multi_reduction <maximumf>, %23, %cst_11 [1] : vector<16x16xf32> to vector<16xf32>
    %25 = vector.shape_cast %24 : vector<16xf32> to vector<16x1xf32>
    %26 = vector.broadcast %25 : vector<16x1xf32> to vector<16x16xf32>
    %27 = arith.subf %23, %26 : vector<16x16xf32>
    %28 = math.exp %27 : vector<16x16xf32>
    %cst_12 = arith.constant dense<0.000000e+00> : vector<16xf32>
    %29 = vector.multi_reduction <add>, %28, %cst_12 [1] : vector<16x16xf32> to vector<16xf32>
    %30 = vector.shape_cast %29 : vector<16xf32> to vector<16x1xf32>
    %31 = tpu.reciprocal %30 : vector<16x1xf32> -> vector<16x1xf32>
    %32 = vector.broadcast %31 : vector<16x1xf32> to vector<16x16xf32>
    %33 = arith.mulf %28, %32 : vector<16x16xf32>
    %cst_13 = arith.constant dense<0.000000e+00> : vector<16x128xf32>
    %34 = tpu.matmul %33, %9, %cst_13 {dimension_numbers = #tpu.dot_dimension_numbers<[1], [0], [0], [1], [0, 0, 1, 1], [], []>} : vector<16x16xf32>, vector<16x128xf32>, vector<16x128xf32> -> vector<16x128xf32>
    %35 = vector.shape_cast %17 : vector<1x128xi1> to vector<1x128xi1>
    %36 = vector.broadcast %35 : vector<1x128xi1> to vector<16x128xi1>
    %37 = arith.select %36, %34, %12 : vector<16x128xi1>, vector<16x128xf32>
    %c15_i32_14 = arith.constant 15 : i32
    %38 = vector.broadcast %c15_i32_14 : i32 to vector<1x128xi32>
    %39 = arith.cmpi sge, %11, %38 : vector<1x128xi32>
    %c30_i32 = arith.constant 30 : i32
    %40 = vector.broadcast %c30_i32 : i32 to vector<1x128xi32>
    %41 = arith.cmpi slt, %11, %40 : vector<1x128xi32>
    %42 = arith.andi %39, %41 : vector<1x128xi1>
    %cst_15 = arith.constant 0.000000e+00 : f32
    %43 = vector.shape_cast %42 : vector<1x128xi1> to vector<1x128xi1>
    %44 = vector.broadcast %43 : vector<1x128xi1> to vector<16x128xi1>
    %45 = vector.broadcast %cst_15 : f32 to vector<16x128xf32>
    %46 = arith.select %44, %7, %45 : vector<16x128xi1>, vector<16x128xf32>
    %cst_16 = arith.constant dense<0.000000e+00> : vector<16x16xf32>
    %47 = tpu.matmul %46, %8, %cst_16 {dimension_numbers = #tpu.dot_dimension_numbers<[1], [1], [0], [0], [0, 0, 1, 0], [], []>} : vector<16x128xf32>, vector<16x128xf32>, vector<16x16xf32> -> vector<16x16xf32>
    %48 = arith.addf %47, %10 : vector<16x16xf32>
    %cst_17 = arith.constant dense<0xFF800000> : vector<16xf32>
    %49 = vector.multi_reduction <maximumf>, %48, %cst_17 [1] : vector<16x16xf32> to vector<16xf32>
    %50 = vector.shape_cast %49 : vector<16xf32> to vector<16x1xf32>
    %51 = vector.broadcast %50 : vector<16x1xf32> to vector<16x16xf32>
    %52 = arith.subf %48, %51 : vector<16x16xf32>
    %53 = math.exp %52 : vector<16x16xf32>
    %cst_18 = arith.constant dense<0.000000e+00> : vector<16xf32>
    %54 = vector.multi_reduction <add>, %53, %cst_18 [1] : vector<16x16xf32> to vector<16xf32>
    %55 = vector.shape_cast %54 : vector<16xf32> to vector<16x1xf32>
    %56 = tpu.reciprocal %55 : vector<16x1xf32> -> vector<16x1xf32>
    %57 = vector.broadcast %56 : vector<16x1xf32> to vector<16x16xf32>
    %58 = arith.mulf %53, %57 : vector<16x16xf32>
    %cst_19 = arith.constant dense<0.000000e+00> : vector<16x128xf32>
    %59 = tpu.matmul %58, %9, %cst_19 {dimension_numbers = #tpu.dot_dimension_numbers<[1], [0], [0], [1], [0, 0, 1, 1], [], []>} : vector<16x16xf32>, vector<16x128xf32>, vector<16x128xf32> -> vector<16x128xf32>
    %60 = vector.shape_cast %42 : vector<1x128xi1> to vector<1x128xi1>
    %61 = vector.broadcast %60 : vector<1x128xi1> to vector<16x128xi1>
    %62 = arith.select %61, %59, %37 : vector<16x128xi1>, vector<16x128xf32>
    %c30_i32_20 = arith.constant 30 : i32
    %63 = vector.broadcast %c30_i32_20 : i32 to vector<1x128xi32>
    %64 = arith.cmpi sge, %11, %63 : vector<1x128xi32>
    %c45_i32 = arith.constant 45 : i32
    %65 = vector.broadcast %c45_i32 : i32 to vector<1x128xi32>
    %66 = arith.cmpi slt, %11, %65 : vector<1x128xi32>
    %67 = arith.andi %64, %66 : vector<1x128xi1>
    %cst_21 = arith.constant 0.000000e+00 : f32
    %68 = vector.shape_cast %67 : vector<1x128xi1> to vector<1x128xi1>
    %69 = vector.broadcast %68 : vector<1x128xi1> to vector<16x128xi1>
    %70 = vector.broadcast %cst_21 : f32 to vector<16x128xf32>
    %71 = arith.select %69, %7, %70 : vector<16x128xi1>, vector<16x128xf32>
    %cst_22 = arith.constant dense<0.000000e+00> : vector<16x16xf32>
    %72 = tpu.matmul %71, %8, %cst_22 {dimension_numbers = #tpu.dot_dimension_numbers<[1], [1], [0], [0], [0, 0, 1, 0], [], []>} : vector<16x128xf32>, vector<16x128xf32>, vector<16x16xf32> -> vector<16x16xf32>
    %73 = arith.addf %72, %10 : vector<16x16xf32>
    %cst_23 = arith.constant dense<0xFF800000> : vector<16xf32>
    %74 = vector.multi_reduction <maximumf>, %73, %cst_23 [1] : vector<16x16xf32> to vector<16xf32>
    %75 = vector.shape_cast %74 : vector<16xf32> to vector<16x1xf32>
    %76 = vector.broadcast %75 : vector<16x1xf32> to vector<16x16xf32>
    %77 = arith.subf %73, %76 : vector<16x16xf32>
    %78 = math.exp %77 : vector<16x16xf32>
    %cst_24 = arith.constant dense<0.000000e+00> : vector<16xf32>
    %79 = vector.multi_reduction <add>, %78, %cst_24 [1] : vector<16x16xf32> to vector<16xf32>
    %80 = vector.shape_cast %79 : vector<16xf32> to vector<16x1xf32>
    %81 = tpu.reciprocal %80 : vector<16x1xf32> -> vector<16x1xf32>
    %82 = vector.broadcast %81 : vector<16x1xf32> to vector<16x16xf32>
    %83 = arith.mulf %78, %82 : vector<16x16xf32>
    %cst_25 = arith.constant dense<0.000000e+00> : vector<16x128xf32>
    %84 = tpu.matmul %83, %9, %cst_25 {dimension_numbers = #tpu.dot_dimension_numbers<[1], [0], [0], [1], [0, 0, 1, 1], [], []>} : vector<16x16xf32>, vector<16x128xf32>, vector<16x128xf32> -> vector<16x128xf32>
    %85 = vector.shape_cast %67 : vector<1x128xi1> to vector<1x128xi1>
    %86 = vector.broadcast %85 : vector<1x128xi1> to vector<16x128xi1>
    %87 = arith.select %86, %84, %62 : vector<16x128xi1>, vector<16x128xf32>
    %c45_i32_26 = arith.constant 45 : i32
    %88 = vector.broadcast %c45_i32_26 : i32 to vector<1x128xi32>
    %89 = arith.cmpi sge, %11, %88 : vector<1x128xi32>
    %c60_i32 = arith.constant 60 : i32
    %90 = vector.broadcast %c60_i32 : i32 to vector<1x128xi32>
    %91 = arith.cmpi slt, %11, %90 : vector<1x128xi32>
    %92 = arith.andi %89, %91 : vector<1x128xi1>
    %cst_27 = arith.constant 0.000000e+00 : f32
    %93 = vector.shape_cast %92 : vector<1x128xi1> to vector<1x128xi1>
    %94 = vector.broadcast %93 : vector<1x128xi1> to vector<16x128xi1>
    %95 = vector.broadcast %cst_27 : f32 to vector<16x128xf32>
    %96 = arith.select %94, %7, %95 : vector<16x128xi1>, vector<16x128xf32>
    %cst_28 = arith.constant dense<0.000000e+00> : vector<16x16xf32>
    %97 = tpu.matmul %96, %8, %cst_28 {dimension_numbers = #tpu.dot_dimension_numbers<[1], [1], [0], [0], [0, 0, 1, 0], [], []>} : vector<16x128xf32>, vector<16x128xf32>, vector<16x16xf32> -> vector<16x16xf32>
    %98 = arith.addf %97, %10 : vector<16x16xf32>
    %cst_29 = arith.constant dense<0xFF800000> : vector<16xf32>
    %99 = vector.multi_reduction <maximumf>, %98, %cst_29 [1] : vector<16x16xf32> to vector<16xf32>
    %100 = vector.shape_cast %99 : vector<16xf32> to vector<16x1xf32>
    %101 = vector.broadcast %100 : vector<16x1xf32> to vector<16x16xf32>
    %102 = arith.subf %98, %101 : vector<16x16xf32>
    %103 = math.exp %102 : vector<16x16xf32>
    %cst_30 = arith.constant dense<0.000000e+00> : vector<16xf32>
    %104 = vector.multi_reduction <add>, %103, %cst_30 [1] : vector<16x16xf32> to vector<16xf32>
    %105 = vector.shape_cast %104 : vector<16xf32> to vector<16x1xf32>
    %106 = tpu.reciprocal %105 : vector<16x1xf32> -> vector<16x1xf32>
    %107 = vector.broadcast %106 : vector<16x1xf32> to vector<16x16xf32>
    %108 = arith.mulf %103, %107 : vector<16x16xf32>
    %cst_31 = arith.constant dense<0.000000e+00> : vector<16x128xf32>
    %109 = tpu.matmul %108, %9, %cst_31 {dimension_numbers = #tpu.dot_dimension_numbers<[1], [0], [0], [1], [0, 0, 1, 1], [], []>} : vector<16x16xf32>, vector<16x128xf32>, vector<16x128xf32> -> vector<16x128xf32>
    %110 = vector.shape_cast %92 : vector<1x128xi1> to vector<1x128xi1>
    %111 = vector.broadcast %110 : vector<1x128xi1> to vector<16x128xi1>
    %112 = arith.select %111, %109, %87 : vector<16x128xi1>, vector<16x128xf32>
    %c0_32 = arith.constant 0 : index
    %c0_33 = arith.constant 0 : index
    %113 = vector.load %arg4[%c0_32, %c0_33] : memref<128x128xf32, #tpu.memory_space<vmem>>, vector<128x128xf32>
    %cst_34 = arith.constant dense<0.000000e+00> : vector<16x128xf32>
    %114 = tpu.matmul %112, %113, %cst_34 {dimension_numbers = #tpu.dot_dimension_numbers<[1], [0], [0], [1], [0, 0, 1, 1], [], []>} : vector<16x128xf32>, vector<128x128xf32>, vector<16x128xf32> -> vector<16x128xf32>
    %c0_35 = arith.constant 0 : index
    %c0_36 = arith.constant 0 : index
    %115 = vector.load %arg5[%c0_35, %c0_36] : memref<1x128xf32, #tpu.memory_space<vmem>>, vector<1x128xf32>
    %116 = vector.broadcast %115 : vector<1x128xf32> to vector<16x128xf32>
    %117 = arith.addf %114, %116 : vector<16x128xf32>
    %118 = vector.shape_cast %117 : vector<16x128xf32> to vector<2x8x128xf32>
    %c0_37 = arith.constant 0 : index
    %c0_38 = arith.constant 0 : index
    %c0_39 = arith.constant 0 : index
    %119 = vector.load %arg7[%c0_37, %c0_38, %c0_39] : memref<2x8x128xf32, #tpu.memory_space<vmem>>, vector<2x8x128xf32>
    tpu.vector_store %arg7[%c0_37, %c0_38, %c0_39], %118 {strides = array<i32>} : memref<2x8x128xf32, #tpu.memory_space<vmem>>, vector<2x8x128xf32>,
    return
  }
  func.func @transform_0(%arg0: i32) -> (i32, i32, i32) {
    %c0_i32 = arith.constant 0 : i32
    %c0_i32_0 = arith.constant 0 : i32
    %c0_i32_1 = arith.constant 0 : i32
    %c0_i32_2 = arith.constant 0 : i32
    return %c0_i32, %c0_i32_0, %c0_i32_1 : i32, i32, i32
  }
  func.func @transform_1(%arg0: i32) -> (i32, i32) {
    %c0_i32 = arith.constant 0 : i32
    %c0_i32_0 = arith.constant 0 : i32
    %c0_i32_1 = arith.constant 0 : i32
    return %c0_i32, %c0_i32_0 : i32, i32
  }
  func.func @transform_2(%arg0: i32) -> (i32, i32) {
    %c0_i32 = arith.constant 0 : i32
    %c0_i32_0 = arith.constant 0 : i32
    %c0_i32_1 = arith.constant 0 : i32
    return %c0_i32, %c0_i32_0 : i32, i32
  }
  func.func @transform_3(%arg0: i32) -> (i32, i32) {
    %c0_i32 = arith.constant 0 : i32
    %c0_i32_0 = arith.constant 0 : i32
    %c0_i32_1 = arith.constant 0 : i32
    return %c0_i32, %c0_i32_0 : i32, i32
  }
  func.func @transform_4(%arg0: i32) -> (i32, i32) {
    %c0_i32 = arith.constant 0 : i32
    %c0_i32_0 = arith.constant 0 : i32
    %c0_i32_1 = arith.constant 0 : i32
    return %c0_i32, %c0_i32_0 : i32, i32
  }
  func.func @transform_5(%arg0: i32) -> (i32, i32) {
    %c0_i32 = arith.constant 0 : i32
    %c0_i32_0 = arith.constant 0 : i32
    %c0_i32_1 = arith.constant 0 : i32
    return %c0_i32, %c0_i32_0 : i32, i32
  }
  func.func @transform_6(%arg0: i32) -> (i32, i32, i32) {
    %c0_i32 = arith.constant 0 : i32
    %c0_i32_0 = arith.constant 0 : i32
    %c0_i32_1 = arith.constant 0 : i32
    %c0_i32_2 = arith.constant 0 : i32
    return %c0_i32, %c0_i32_0, %c0_i32_1 : i32, i32, i32
  }
}

</mosaic_0001>

<bundles_post_ra>
// kernel: multi_head_attention.1
= control target key start
LH: loop header
LB: loop body
LE: loop exit
PB: predicated region body
PF: predicated region fallthrough
CT: control target
= control target key end

     0   :  { %11 = vsyncpa [#allocation3], 0  ;;  %s1831_s0 = inlined_call_operand.vmem [shape: f32[2,8,128], index: 0, kind: input, shape index: {}]   ;;  %s1832_s1 = inlined_call_operand.hbm [shape: f32[128,384], index: 1, kind: input, shape index: {}]   ;;  %s1833_s2 = inlined_call_operand.vmem [shape: f32[1,384], index: 2, kind: input, shape index: {}]   ;;  %s1834_s3 = inlined_call_operand.hbm [shape: f32[128,128], index: 3, kind: input, shape index: {}]   ;;  %s1835_s4 = inlined_call_operand.vmem [shape: f32[1,128], index: 4, kind: input, shape index: {}]   ;;  %s1836_s5 = inlined_call_operand.vmem [shape: f32[16,16], index: 5, kind: input, shape index: {}]   ;;  %s1837_s6 = inlined_call_operand.hbm [shape: f32[2,8,128], index: 6, kind: output, shape index: {}]  }
   0x1   :  { %12 = vsyncpa [#allocation6], 0 }
   0x2   :  { %13 = vsyncpa [#allocation4], 0  ;;  %s1593_s21 = smov [#allocation2]   ;;  %s1521_s25 = scalar_lea.hbm %s1832_s1, 6144 }
   0x3   :  { %s21_s22 = sshll.u32 %s1593_s21, 4  ;;  %p1522_p0 = scmp.ne.s32.totalorder %s1832_s1, %s1521_s25  ;;  %s22_s22 = int_to_ptr.vmem [resolvable:$true] %s21_s22 }
   0x4   :  { %p1525_p1 = scmp.lt.u32.totalorder %s1521_s25, %s1832_s1 }
   0x6   :  { %p1527_p2 = pnand %p1525_p1, %p1522_p0 }
   0x8   :  { %1530 = shalt.err (!%p1527_p2)
}
   0x9   :  { %s1531_s30 = scalar_lea.vmem %s22_s22, 6144  ;;  %p1536_p4 = scmp.lt.s32.totalorder %s22_s22, %s22_s22 }
   0xa   :  { %p1532_p3 = scmp.ne.s32.totalorder %s22_s22, %s1531_s30  ;;  %p1537_p5 = scmp.lt.s32.totalorder %s1531_s30, %s1531_s30 }
   0xc   :  { %p1538_p6 = por %p1537_p5, %p1536_p4 }
   0xe   :  { %p1539_p7 = pnand %p1538_p6, %p1532_p3 }
  0x10   :  { %1542 = shalt.err (!%p1539_p7)
}
  0x11   :  { %s1594_s7 = smov 384   ;;  %s1595_s8 = smov 24  }
  0x12   :  { %27 = dma.hbm_to_vmem [thread:$0]  %s1832_s1, 6144, %s22_s22, [#allocation3], %s1594_s7, %s1594_s7, %s1595_s8  }
  0x13   :  { %s1596_s11 = smov [#allocation5]   ;;  %s1543_s15 = scalar_lea.hbm %s1834_s3, 2048 }
  0x14   :  { %s35_s12 = sshll.u32 %s1596_s11, 4  ;;  %p1544_p8 = scmp.ne.s32.totalorder %s1834_s3, %s1543_s15  ;;  %s36_s12 = int_to_ptr.vmem [resolvable:$true] %s35_s12 }
  0x15   :  { %p1547_p9 = scmp.lt.u32.totalorder %s1543_s15, %s1834_s3 }
  0x17   :  { %p1549_p10 = pnand %p1547_p9, %p1544_p8 }
  0x19   :  { %1552 = shalt.err (!%p1549_p10)
}
  0x1a   :  { %s1553_s20 = scalar_lea.vmem %s36_s12, 2048  ;;  %p1558_p12 = scmp.lt.s32.totalorder %s36_s12, %s36_s12 }
  0x1b   :  { %p1554_p11 = scmp.ne.s32.totalorder %s36_s12, %s1553_s20  ;;  %p1559_p13 = scmp.lt.s32.totalorder %s1553_s20, %s1553_s20 }
  0x1d   :  { %p1560_p0 = por %p1559_p13, %p1558_p12 }
  0x1f   :  { %p1561_p1 = pnand %p1560_p0, %p1554_p11 }
  0x21   :  { %1564 = shalt.err (!%p1561_p1)
}
  0x22   :  { %s1597_s1 = smov 128   ;;  %s1598_s21 = smov 8  }
  0x23   :  { %41 = dma.hbm_to_vmem [thread:$0]  %s1834_s3, 2048, %s36_s12, [#allocation6], %s1597_s1, %s1597_s1, %s1598_s21  }
  0x24   :  { %1587 = dma.done.wait [#allocation3], 6144  }
  0x25   :  { %1588 = vsyncadd [#allocation3], 4294961152 }
  0x26   :  { %1589 = dma.done.wait [#allocation6], 2048  }
  0x27   :  { %1590 = vsyncadd [#allocation6], 4294965248  ;;  %v1599_v0 = vmov 0.0   ;;  %v55_v1 = vld [vmem:[#allocation2 + $0x8] sm:$0xff]  ;;  %v58_v2 = vld [vmem:[#allocation2 + $0x20] sm:$0xff]  ;;  %vm357_vm1 = vcmask 130048  }
  0x28   :  { %183 = vmatprep.mubr.f32.mxu0 %v1599_v0  ;;  %v54_v3 = vld [vmem:[#allocation2] sm:$0xff]  ;;  %v1353_v4 = vpack.c.bf16 %v58_v2, %v55_v1  ;;  %v57_v5 = vld [vmem:[#allocation2 + $0x18] sm:$0xff]  ;;  %v64_v7 = vld [vmem:[#allocation2 + $0x50] sm:$0xff]  ;;  %s1600_s8 = smov [#allocation7]  }
  0x29   :  { %v61_v6 = vld [vmem:[#allocation2 + $0x38] sm:$0xff]  ;;  %v1355_v8 = vpack.c.bf16 %v57_v5, %v54_v3  ;;  %v60_v10 = vld [vmem:[#allocation2 + $0x30] sm:$0xff]  ;;  %v63_v11 = vld [vmem:[#allocation2 + $0x48] sm:$0xff]  ;;  %s1129_s9 = sshll.u32 %s1600_s8, 4  ;;  %s1130_s9 = int_to_ptr.vmem [resolvable:$true] %s1129_s9 }
  0x2a   :  { %v1357_v9 = vpack.c.bf16 %v64_v7, %v61_v6  ;;  %v67_v12 = vld [vmem:[#allocation2 + $0x68] sm:$0xff]  ;;  %1354 = vmatprep.subr.bf16.mxu0 %v1353_v4  ;;  %v70_v13 = vld [vmem:[#allocation2 + $0x80] sm:$0xff]  ;;  %v1359_v14 = vpack.c.bf16 %v63_v11, %v60_v10  ;;  %v56_v15 = vld [vmem:[#allocation2 + $0x10] sm:$0xff]  ;;  %s1565_s10 = scalar_lea.vmem %s1130_s9, 256  ;;  %p1570_p3 = scmp.lt.s32.totalorder %s1130_s9, %s1130_s9 }
  0x2b   :  { %1356 = vmatpush1.bf16.msra.mxu0 %v1355_v8  ;;  %v1361_v16 = vpack.c.bf16 %v70_v13, %v67_v12  ;;  %v66_v17 = vld [vmem:[#allocation2 + $0x60] sm:$0xff]  ;;  %v69_v18 = vld [vmem:[#allocation2 + $0x78] sm:$0xff]  ;;  %v59_v19 = vld [vmem:[#allocation2 + $0x28] sm:$0xff]  ;;  %v104_v12 = vlaneseq  ;;  %p1566_p2 = scmp.ne.s32.totalorder %s1130_s9, %s1565_s10  ;;  %p1571_p4 = scmp.lt.s32.totalorder %s1565_s10, %s1565_s10 }
  0x2c   :  { %1358 = vmatprep.subr.bf16.mxu0 %v1357_v9  ;;  %v73_v20 = vld [vmem:[#allocation2 + $0x98] sm:$0xff]  ;;  %v76_v21 = vld [vmem:[#allocation2 + $0xb0] sm:$0xff]  ;;  %v1385_v22 = vpack.c.bf16 %v59_v19, %v56_v15  ;;  %v62_v23 = vld [vmem:[#allocation2 + $0x40] sm:$0xff]  ;;  %v1363_v25 = vpack.c.bf16 %v69_v18, %v66_v17 }
  0x2d   :  { %v65_v24 = vld [vmem:[#allocation2 + $0x58] sm:$0xff]  ;;  %v68_v27 = vld [vmem:[#allocation2 + $0x70] sm:$0xff]  ;;  %v1365_v28 = vpack.c.bf16 %v76_v21, %v73_v20  ;;  %v75_v30 = vld [vmem:[#allocation2 + $0xa8] sm:$0xff]  ;;  %v105_v13 = vshrl.u32 %v104_v12, 7  ;;  %p1572_p5 = por %p1571_p4, %p1570_p3 }
  0x2e   :  { %1386 = vmatprep.subr.bf16.mxu1 %v1385_v22  ;;  %v1389_v26 = vpack.c.bf16 %v65_v24, %v62_v23  ;;  %v72_v29 = vld [vmem:[#allocation2 + $0x90] sm:$0xff]  ;;  %v71_v31 = vld [vmem:[#allocation2 + $0x88] sm:$0xff]  ;;  %v82_v33 = vld [vmem:[#allocation2 + $0xe0] sm:$0xff] }
  0x2f   :  { %1360 = vmatpush1.bf16.msra.mxu0 %v1359_v14  ;;  %1388 = vmatpush3.bf16.msra.mxu1 %v1385_v22  ;;  %v79_v32 = vld [vmem:[#allocation2 + $0xc8] sm:$0xff]  ;;  %v1393_v34 = vpack.c.bf16 %v71_v31, %v68_v27  ;;  %v74_v35 = vld [vmem:[#allocation2 + $0xa0] sm:$0xff]  ;;  %v77_v36 = vld [vmem:[#allocation2 + $0xb8] sm:$0xff]  ;;  %v1367_v37 = vpack.c.bf16 %v75_v30, %v72_v29  ;;  %v106_v14 = vsub.s32 0, %v105_v13  ;;  %v110_v18 = vsub.s32 1, %v105_v13  ;;  %p1573_p6 = pnand %p1572_p5, %p1566_p2 }
  0x30   :  { %1362 = vmatprep.subr.bf16.mxu0 %v1361_v16  ;;  %1390 = vmatprep.subr.bf16.mxu1 %v1389_v26  ;;  %v1369_v38 = vpack.c.bf16 %v82_v33, %v79_v32  ;;  %v78_v39 = vld [vmem:[#allocation2 + $0xc0] sm:$0xff]  ;;  %v81_v40 = vld [vmem:[#allocation2 + $0xd8] sm:$0xff]  ;;  %v88_v42 = vld [vmem:[#allocation2 + $0x110] sm:$0xff]  ;;  %v1397_v43 = vpack.c.bf16 %v77_v36, %v74_v35  ;;  %v1674_v16 = vand.u32 127, %v104_v12  ;;  %v114_v19 = vsub.s32 2, %v105_v13 }
  0x31   :  { %v85_v41 = vld [vmem:[#allocation2 + $0xf8] sm:$0xff]  ;;  %v52_v44 = vld [vmem:[%s1831_s0] sm:$0xff]  ;;  %v80_v45 = vld [vmem:[#allocation2 + $0xd0] sm:$0xff]  ;;  %v1371_v47 = vpack.c.bf16 %v81_v40, %v78_v39 }
  0x32   :  { %v83_v46 = vld [vmem:[#allocation2 + $0xe8] sm:$0xff]  ;;  %1259 = vmatprep.mubr.f32.mxu1 %v52_v44  ;;  %v1373_v48 = vpack.c.bf16 %v88_v42, %v85_v41  ;;  %v84_v49 = vld [vmem:[#allocation2 + $0xf0] sm:$0xff]  ;;  %v94_v52 = vld [vmem:[#allocation2 + $0x140] sm:$0xff]  ;;  %vm276_vm0 = vcmp.lt.s32.totalorder %v1674_v16, 15  ;;  %vm463_vm2 = vcmp.ge.s32.totalorder %v1674_v16, 15  ;;  %vm464_vm3 = vcmp.lt.s32.totalorder %v1674_v16, 30 }
  0x33   :  { %1364 = vmatpush1.bf16.msra.mxu0 %v1363_v25  ;;  %1392 = vmatpush3.bf16.msra.mxu1 %v1389_v26  ;;  %v87_v50 = vld [vmem:[#allocation2 + $0x108] sm:$0xff]  ;;  %v1401_v53 = vpack.c.bf16 %v83_v46, %v80_v45  ;;  %v86_v54 = vld [vmem:[#allocation2 + $0x100] sm:$0xff]  ;;  %v89_v55 = vld [vmem:[#allocation2 + $0x118] sm:$0xff]  ;;  %vm650_vm5 = vcmp.ge.s32.totalorder %v1674_v16, 30  ;;  %vm651_vm6 = vcmp.lt.s32.totalorder %v1674_v16, 45  ;;  %vm837_vm8 = vcmp.ge.s32.totalorder %v1674_v16, 45 }
  0x34   :  { %1366 = vmatprep.subr.bf16.mxu0 %v1365_v28  ;;  %1394 = vmatprep.subr.bf16.mxu1 %v1393_v34  ;;  %v91_v51 = vld [vmem:[#allocation2 + $0x128] sm:$0xff]  ;;  %v1375_v56 = vpack.c.bf16 %v87_v50, %v84_v49  ;;  %v90_v58 = vld [vmem:[#allocation2 + $0x120] sm:$0xff]  ;;  %v93_v59 = vld [vmem:[#allocation2 + $0x138] sm:$0xff]  ;;  %v1405_v62 = vpack.c.bf16 %v89_v55, %v86_v54  ;;  %vm838_vm9 = vcmp.lt.s32.totalorder %v1674_v16, 60 }
  0x35   :  { %v1377_v57 = vpack.c.bf16 %v94_v52, %v91_v51  ;;  %v97_v60 = vld [vmem:[#allocation2 + $0x158] sm:$0xff]  ;;  %v100_v61 = vld [vmem:[#allocation2 + $0x170] sm:$0xff]  ;;  %v95_v1 = vld [vmem:[#allocation2 + $0x148] sm:$0xff]  ;;  %v1379_v2 = vpack.c.bf16 %v93_v59, %v90_v58 }
  0x36   :  { %v92_v63 = vld [vmem:[#allocation2 + $0x130] sm:$0xff]  ;;  %v1381_v3 = vpack.c.bf16 %v100_v61, %v97_v60  ;;  %v99_v5 = vld [vmem:[#allocation2 + $0x168] sm:$0xff]  ;;  %v98_v7 = vld [vmem:[#allocation2 + $0x160] sm:$0xff] }
  0x37   :  { %1368 = vmatpush1.bf16.msra.mxu0 %v1367_v37  ;;  %1396 = vmatpush3.bf16.msra.mxu1 %v1393_v34  ;;  %v96_v4 = vld [vmem:[#allocation2 + $0x150] sm:$0xff]  ;;  %v1409_v6 = vpack.c.bf16 %v95_v1, %v92_v63  ;;  %v101_v8 = vld [vmem:[#allocation2 + $0x178] sm:$0xff]  ;;  %v53_v11 = vld [vmem:[%s1831_s0 + $0x8] sm:$0xff] }
  0x38   :  { %1370 = vmatprep.subr.bf16.mxu0 %v1369_v38  ;;  %1398 = vmatprep.subr.bf16.mxu1 %v1397_v43  ;;  %v1383_v9 = vpack.c.bf16 %v99_v5, %v96_v4  ;;  %v1413_v10 = vpack.c.bf16 %v101_v8, %v98_v7  ;;  %v102_v15 = vld [vmem:[%s1833_s2] sm:$0x7]  ;;  %v1707_v37 = vld [vmem:[%s1836_s5 + $0x8] sm:$0xff]  ;;  %vm1718_vm4 = vmand %vm463_vm2, %vm464_vm3 }
  0x39   :  { %v107_v17 = vrot.slane %v102_v15, %v106_v14  ;;  %v111_v22 = vrot.slane %v102_v15, %v110_v18  ;;  %v115_v23 = vrot.slane %v102_v15, %v114_v19  ;;  %v1702_v35 = vld [vmem:[%s1836_s5] sm:$0xff]  ;;  %vm1730_vm7 = vmand %vm650_vm5, %vm651_vm6 }
  0x3a   :  { %vm1763_vm10 = vmand %vm837_vm8, %vm838_vm9  ;;  %v1158_v60 = vld [vmem:[%s1835_s4] ss:$0 sm:$0xff] }
  0x3b   :  { %1372 = vmatpush1.bf16.msra.mxu0 %v1371_v47  ;;  %1400 = vmatpush3.bf16.msra.mxu1 %v1397_v43 }
  0x3c   :  { %1374 = vmatprep.subr.bf16.mxu0 %v1373_v48  ;;  %1402 = vmatprep.subr.bf16.mxu1 %v1401_v53 }
  0x3f   :  { %1376 = vmatpush1.bf16.msra.mxu0 %v1375_v56  ;;  %1404 = vmatpush3.bf16.msra.mxu1 %v1401_v53 }
  0x40   :  { %1378 = vmatprep.subr.bf16.mxu0 %v1377_v57  ;;  %1406 = vmatprep.subr.bf16.mxu1 %v1405_v62 }
  0x43   :  { %1380 = vmatpush1.bf16.msra.mxu0 %v1379_v2  ;;  %1408 = vmatpush3.bf16.msra.mxu1 %v1405_v62 }
  0x44   :  { %1382 = vmatprep.subr.bf16.mxu0 %v1381_v3  ;;  %1410 = vmatprep.subr.bf16.mxu1 %v1409_v6 }
  0x47   :  { %1384 = vmatpush1.bf16.msra.mxu0 %v1383_v9  ;;  %1412 = vmatpush3.bf16.msra.mxu1 %v1409_v6 }
  0x48   :  { %1414 = vmatprep.subr.bf16.mxu1 %v1413_v10 }
  0x4a   :  { %184 = vmatmul.mubr.f32.vlgmr.msra.gmra.mrb[0].mxu0 %v52_v44 }
  0x4b   :  { %189 = vmatprep.mubr.f32.mxu0 %v1599_v0  ;;  %1416 = vmatpush3.bf16.msra.mxu1 %v1413_v10 }
  0x4e   :  { %190 = vmatmul.mubr.f32.gmra.mrb[2].mxu0 %v53_v11  ;;  %1260 = vmatmul.mubr.f32.vlgmr.msra.gmra.mrb[0].mxu1 %v53_v11 }
 0x11d   :  { %v185_v0 = vpop.f32.mrb[0].mxu0 }
 0x11e   :  { %v1677_v20 = vadd.f32 %v185_v0, %v107_v17  ;;  %v187_v21 = vpop.f32.mrb[1].mxu0 }
 0x11f   :  { %v188_v27 = vadd.f32 %v187_v21, %v111_v22 }
 0x120   :  { %1266 = vmatprep.mubr.msk.f32.mxu1 %vm276_vm0, %v1677_v20 }
 0x121   :  { %v191_v24 = vpop.f32.mrb[2].mxu0  ;;  %v1261_v26 = vpop.f32.mrb[0].mxu1 }
 0x122   :  { %v193_v25 = vpop.f32.mrb[3].mxu0  ;;  %v268_v29 = vadd.f32 %v1261_v26, %v115_v23  ;;  %v262_v30 = vpop.f32.mrb[1].mxu1  ;;  %v1692_v34 = vadd.f32 %v191_v24, %v107_v17 }
 0x123   :  { %v194_v28 = vadd.f32 %v193_v25, %v111_v22  ;;  %v263_v31 = vadd.f32 %v262_v30, %v115_v23 }
 0x125   :  { %v1682_v32 = vpack.c.bf16 %v194_v28, %v188_v27  ;;  %v1684_v33 = vpack.c.bf16 %v268_v29, %v263_v31 }
 0x127   :  { %1418 = vmatprep.subr.bf16.mxu1 %v1682_v32  ;;  %1430 = vmatprep.subr.bf16.mxu0 %v1684_v33 }
 0x128   :  { %1420 = vmatpush3.bf16.xpose.msra.mxu1 %v1682_v32  ;;  %1432 = vmatpush3.bf16.msra.mxu0 %v1684_v33 }
 0x129   :  { %1422 = vmatprep.subr.bf16.mxu1 %v1684_v33  ;;  %1446 = vmatprep.subr.bf16.mxu0 %v1684_v33 }
 0x12f   :  { %1267 = vmatmul.mubr.msk.f32.vlgmr.msra.gmra.mrb[2].mxu1 %vm276_vm0, %v1692_v34 }
 0x130   :  { %1424 = vmatpush3.bf16.msra.mxu1 %v1684_v33 }
 0x131   :  { %1426 = vmatprep.subr.bf16.mxu1 %v1682_v32 }
 0x202   :  { %v1268_v36 = vpop.f32.mrb[2].mxu1 }
 0x203   :  { %v348_v38 = vpop.f32.mrb[3].mxu1  ;;  %v354_v40 = vadd.f32 %v1268_v36, %v1707_v37 }
 0x204   :  { %v349_v39 = vadd.f32 %v348_v38, %v1702_v35 }
 0x205   :  { %v361_v42 = vsel %vm357_vm1, %v354_v40, -inf }
 0x206   :  { %v358_v41 = vsel %vm357_vm1, %v349_v39, -inf }
 0x207   :  { %359 = vmax.xlane.f32.xlu0 %v358_v41 }
 0x20b   :  { %362 = vmax.xlane.f32.xlu0 %v361_v42 }
 0x294   :  { %v360_v43 = vpop.xlane.xlu0 %359 }
 0x295   :  { %v364_v44 = vsub.f32 %v349_v39, %v360_v43 }
 0x297   :  { %v366_v45 = vmul.f32 1.442695, %v364_v44 }
 0x298   :  { %v363_v46 = vpop.xlane.xlu0 %362 }
 0x299   :  { %1489 = vpow2.f32 %v366_v45  ;;  %v365_v47 = vsub.f32 %v354_v40, %v363_v46 }
 0x29b   :  { %v368_v48 = vmul.f32 1.442695, %v365_v47 }
 0x29d   :  { %1491 = vpow2.f32 %v368_v48 }
 0x2a3   :  { %v1490_v49 = vpop.eup %1489 }
 0x2a4   :  { %v370_v50 = vsel %vm357_vm1, %v1490_v49, 0.0 }
 0x2a5   :  { %371 = vadd.xlane.f32.xlu1 %v370_v50 }
 0x2a7   :  { %v1492_v51 = vpop.eup %1491 }
 0x2a8   :  { %v373_v52 = vsel %vm357_vm1, %v1492_v51, 0.0 }
 0x2a9   :  { %374 = vadd.xlane.f32.xlu1 %v373_v52 }
 0x332   :  { %v372_v53 = vpop.xlane.xlu1 %371 }
 0x333   :  { %1493 = vrcp.f32 %v372_v53 }
 0x336   :  { %v375_v54 = vpop.xlane.xlu1 %374 }
 0x337   :  { %1495 = vrcp.f32 %v375_v54 }
 0x33d   :  { %v1494_v55 = vpop.eup %1493 }
 0x33e   :  { %v378_v56 = vmul.f32 %v1494_v55, %v1490_v49 }
 0x340   :  { %1273 = vmatprep.mubr.msk.f32.mxu1 %vm357_vm1, %v378_v56 }
 0x341   :  { %v1496_v57 = vpop.eup %1495 }
 0x342   :  { %v379_v58 = vmul.f32 %v1496_v57, %v1492_v51 }
 0x344   :  { %1274 = vmatmul.mubr.msk.f32.vlgmr.msra.gmra.mrb[4].mxu1 %vm357_vm1, %v379_v58 }
 0x345   :  { %1428 = vmatpush3.bf16.xpose.msra.mxu1 %v1682_v32  ;;  %1280 = vmatprep.mubr.msk.f32.mxu1 %vm1718_vm4, %v1677_v20 }
 0x346   :  { %1434 = vmatprep.subr.bf16.mxu1 %v1682_v32 }
 0x34c   :  { %1281 = vmatmul.mubr.msk.f32.vlgmr.msra.gmra.mrb[6].mxu1 %vm1718_vm4, %v1692_v34 }
 0x34d   :  { %1436 = vmatpush3.bf16.xpose.msra.mxu1 %v1682_v32  ;;  %1294 = vmatprep.mubr.msk.f32.mxu1 %vm1730_vm7, %v1677_v20 }
 0x34e   :  { %1438 = vmatprep.subr.bf16.mxu1 %v1684_v33 }
 0x354   :  { %1295 = vmatmul.mubr.msk.f32.vlgmr.msra.gmra.mrb[8].mxu1 %vm1730_vm7, %v1692_v34 }
 0x355   :  { %1440 = vmatpush3.bf16.msra.mxu1 %v1684_v33 }
 0x356   :  { %1442 = vmatprep.subr.bf16.mxu1 %v1682_v32 }
 0x417   :  { %v1747_v61 = vpop.f32.mrb[4].mxu1 }
 0x418   :  { %v1749_v62 = vpop.f32.mrb[5].mxu1 }
 0x41f   :  { %v1282_v63 = vpop.f32.mrb[6].mxu1 }
 0x420   :  { %v536_v1 = vpop.f32.mrb[7].mxu1  ;;  %v542_v17 = vadd.f32 %v1282_v63, %v1707_v37 }
 0x421   :  { %v537_v19 = vadd.f32 %v536_v1, %v1702_v35 }
 0x422   :  { %v548_v21 = vsel %vm357_vm1, %v542_v17, -inf }
 0x423   :  { %v545_v22 = vsel %vm357_vm1, %v537_v19, -inf }
 0x427   :  { %v1296_v2 = vpop.f32.mrb[8].mxu1 }
 0x428   :  { %v729_v3 = vadd.f32 %v1296_v2, %v1707_v37  ;;  %v723_v4 = vpop.f32.mrb[9].mxu1 }
 0x429   :  { %v724_v5 = vadd.f32 %v723_v4, %v1702_v35 }
 0x42a   :  { %v735_v6 = vsel %vm357_vm1, %v729_v3, -inf }
 0x42b   :  { %736 = vmax.xlane.f32.xlu1 %v735_v6  ;;  %v732_v7 = vsel %vm357_vm1, %v724_v5, -inf  ;;  %v1025_v6 = vld [vmem:[#allocation5 + $0x8] sm:$0xff] }
 0x42c   :  { %733 = vmax.xlane.f32.xlu0 %v732_v7 }
 0x4b8   :  { %v737_v8 = vpop.xlane.xlu1 %736 }
 0x4b9   :  { %v739_v9 = vsub.f32 %v729_v3, %v737_v8  ;;  %v734_v10 = vpop.xlane.xlu0 %733 }
 0x4ba   :  { %v738_v11 = vsub.f32 %v724_v5, %v734_v10  ;;  %v1024_v5 = vld [vmem:[#allocation5] sm:$0xff] }
 0x4bb   :  { %v742_v12 = vmul.f32 1.442695, %v739_v9  ;;  %v1449_v7 = vpack.c.bf16 %v1025_v6, %v1024_v5 }
 0x4bc   :  { %v740_v13 = vmul.f32 1.442695, %v738_v11  ;;  %v1026_v11 = vld [vmem:[#allocation5 + $0x10] sm:$0xff] }
 0x4bd   :  { %1497 = vpow2.f32 %v742_v12  ;;  %v1027_v12 = vld [vmem:[#allocation5 + $0x18] sm:$0xff] }
 0x4be   :  { %1499 = vpow2.f32 %v740_v13 }
 0x4c7   :  { %v1498_v14 = vpop.eup %1497 }
 0x4c8   :  { %v1500_v15 = vpop.eup %1499  ;;  %v747_v18 = vsel %vm357_vm1, %v1498_v14, 0.0 }
 0x4c9   :  { %748 = vadd.xlane.f32.xlu1 %v747_v18  ;;  %v744_v0 = vsel %vm357_vm1, %v1500_v15, 0.0  ;;  %v1028_v18 = vld [vmem:[#allocation5 + $0x20] sm:$0xff] }
 0x4ca   :  { %745 = vadd.xlane.f32.xlu0 %v744_v0  ;;  %v1030_v0 = vld [vmem:[#allocation5 + $0x30] sm:$0xff] }
 0x4cd   :  { %549 = vmax.xlane.f32.xlu1 %v548_v21  ;;  %v1031_v21 = vld [vmem:[#allocation5 + $0x38] sm:$0xff] }
 0x4ce   :  { %546 = vmax.xlane.f32.xlu0 %v545_v22  ;;  %v1461_v22 = vpack.c.bf16 %v1031_v21, %v1030_v0 }
 0x556   :  { %v749_v23 = vpop.xlane.xlu1 %748 }
 0x557   :  { %1501 = vrcp.f32 %v749_v23  ;;  %v746_v24 = vpop.xlane.xlu0 %745  ;;  %v1032_v23 = vld [vmem:[#allocation5 + $0x40] sm:$0xff] }
 0x558   :  { %1503 = vrcp.f32 %v746_v24  ;;  %v1033_v24 = vld [vmem:[#allocation5 + $0x48] sm:$0xff] }
 0x55a   :  { %v550_v30 = vpop.xlane.xlu1 %549 }
 0x55b   :  { %v547_v31 = vpop.xlane.xlu0 %546  ;;  %v552_v36 = vsub.f32 %v542_v17, %v550_v30  ;;  %v1453_v17 = vpack.c.bf16 %v1027_v12, %v1026_v11  ;;  %v1036_v30 = vld [vmem:[#allocation5 + $0x60] sm:$0xff] }
 0x55c   :  { %v551_v38 = vsub.f32 %v537_v19, %v547_v31  ;;  %v1029_v19 = vld [vmem:[#allocation5 + $0x28] sm:$0xff] }
 0x55d   :  { %v555_v39 = vmul.f32 1.442695, %v552_v36  ;;  %v1037_v31 = vld [vmem:[#allocation5 + $0x68] sm:$0xff] }
 0x55e   :  { %v553_v40 = vmul.f32 1.442695, %v551_v38  ;;  %v1473_v36 = vpack.c.bf16 %v1037_v31, %v1036_v30  ;;  %v462_v38 = vsel %vm276_vm0, %v1747_v61, 0.0 }
 0x55f   :  { %1505 = vpow2.f32 %v555_v39 }
 0x560   :  { %1507 = vpow2.f32 %v553_v40  ;;  %v461_v40 = vsel %vm276_vm0, %v1749_v62, 0.0 }
 0x561   :  { %v1502_v25 = vpop.eup %1501 }
 0x562   :  { %v1504_v26 = vpop.eup %1503  ;;  %v753_v28 = vmul.f32 %v1502_v25, %v1498_v14  ;;  %v1465_v25 = vpack.c.bf16 %v1033_v24, %v1032_v23 }
 0x563   :  { %v752_v27 = vmul.f32 %v1504_v26, %v1500_v15  ;;  %v1034_v26 = vld [vmem:[#allocation5 + $0x50] sm:$0xff] }
 0x565   :  { %1301 = vmatprep.mubr.msk.f32.mxu1 %vm357_vm1, %v752_v27  ;;  %v1035_v27 = vld [vmem:[#allocation5 + $0x58] sm:$0xff] }
 0x566   :  { %1302 = vmatmul.mubr.msk.f32.vlgmr.msra.gmra.mrb[10].mxu1 %vm357_vm1, %v753_v28  ;;  %v1469_v28 = vpack.c.bf16 %v1035_v27, %v1034_v26 }
 0x567   :  { %1444 = vmatpush3.bf16.xpose.msra.mxu1 %v1682_v32  ;;  %1308 = vmatprep.mubr.msk.f32.mxu1 %vm1763_vm10, %v1677_v20 }
 0x569   :  { %v1506_v45 = vpop.eup %1505 }
 0x56a   :  { %v1508_v47 = vpop.eup %1507  ;;  %v560_v48 = vsel %vm357_vm1, %v1506_v45, 0.0 }
 0x56b   :  { %v557_v49 = vsel %vm357_vm1, %v1508_v47, 0.0 }
 0x56e   :  { %1309 = vmatmul.mubr.msk.f32.vlgmr.msra.gmra.mrb[12].mxu1 %vm1763_vm10, %v1692_v34 }
 0x639   :  { %v1776_v41 = vpop.f32.mrb[10].mxu1 }
 0x63a   :  { %v1778_v42 = vpop.f32.mrb[11].mxu1 }
 0x641   :  { %v1310_v32 = vpop.f32.mrb[12].mxu1 }
 0x642   :  { %v916_v43 = vadd.f32 %v1310_v32, %v1707_v37  ;;  %v910_v20 = vpop.f32.mrb[13].mxu1 }
 0x643   :  { %v911_v44 = vadd.f32 %v910_v20, %v1702_v35 }
 0x644   :  { %v922_v34 = vsel %vm357_vm1, %v916_v43, -inf }
 0x645   :  { %923 = vmax.xlane.f32.xlu1 %v922_v34  ;;  %v919_v46 = vsel %vm357_vm1, %v911_v44, -inf  ;;  %v1038_v34 = vld [vmem:[#allocation5 + $0x70] sm:$0xff] }
 0x646   :  { %920 = vmax.xlane.f32.xlu0 %v919_v46 }
 0x649   :  { %561 = vadd.xlane.f32.xlu1 %v560_v48 }
 0x64a   :  { %558 = vadd.xlane.f32.xlu0 %v557_v49 }
 0x6d2   :  { %v924_v50 = vpop.xlane.xlu1 %923 }
 0x6d3   :  { %v926_v51 = vsub.f32 %v916_v43, %v924_v50  ;;  %v921_v37 = vpop.xlane.xlu0 %920 }
 0x6d4   :  { %v925_v52 = vsub.f32 %v911_v44, %v921_v37 }
 0x6d5   :  { %v929_v53 = vmul.f32 1.442695, %v926_v51 }
 0x6d6   :  { %v927_v35 = vmul.f32 1.442695, %v925_v52  ;;  %v562_v54 = vpop.xlane.xlu1 %561 }
 0x6d7   :  { %1509 = vpow2.f32 %v929_v53  ;;  %v559_v55 = vpop.xlane.xlu0 %558 }
 0x6d8   :  { %1511 = vpow2.f32 %v927_v35 }
 0x6d9   :  { %1513 = vrcp.f32 %v562_v54 }
 0x6da   :  { %1515 = vrcp.f32 %v559_v55 }
 0x6e1   :  { %v1510_v56 = vpop.eup %1509 }
 0x6e2   :  { %v1512_v57 = vpop.eup %1511  ;;  %v934_v58 = vsel %vm357_vm1, %v1510_v56, 0.0 }
 0x6e3   :  { %v1514_v63 = vpop.eup %1513  ;;  %935 = vadd.xlane.f32.xlu1 %v934_v58  ;;  %v931_v1 = vsel %vm357_vm1, %v1512_v57, 0.0 }
 0x6e4   :  { %v1516_v2 = vpop.eup %1515  ;;  %932 = vadd.xlane.f32.xlu0 %v931_v1  ;;  %v566_v4 = vmul.f32 %v1514_v63, %v1506_v45  ;;  %v1039_v45 = vld [vmem:[#allocation5 + $0x78] sm:$0xff] }
 0x6e5   :  { %v565_v3 = vmul.f32 %v1516_v2, %v1508_v47  ;;  %v1477_v46 = vpack.c.bf16 %v1039_v45, %v1038_v34 }
 0x6e7   :  { %1287 = vmatprep.mubr.msk.f32.mxu0 %vm357_vm1, %v565_v3 }
 0x6e8   :  { %1288 = vmatmul.mubr.msk.f32.vlgmr.msra.gmra.mrb[4].mxu0 %vm357_vm1, %v566_v4 }
 0x6e9   :  { %1448 = vmatpush3.bf16.msra.mxu0 %v1684_v33  ;;  %v1457_v33 = vpack.c.bf16 %v1029_v19, %v1028_v18 }
 0x6ea   :  { %1450 = vmatprep.subr.bf16.mxu0 %v1449_v7 }
 0x770   :  { %v936_v8 = vpop.xlane.xlu1 %935 }
 0x771   :  { %1517 = vrcp.f32 %v936_v8  ;;  %v933_v9 = vpop.xlane.xlu0 %932 }
 0x772   :  { %1519 = vrcp.f32 %v933_v9 }
 0x77b   :  { %v1518_v10 = vpop.eup %1517 }
 0x77c   :  { %v1520_v13 = vpop.eup %1519  ;;  %v940_v15 = vmul.f32 %v1518_v10, %v1510_v56 }
 0x77d   :  { %v939_v14 = vmul.f32 %v1520_v13, %v1512_v57 }
 0x77f   :  { %1315 = vmatprep.mubr.msk.f32.mxu0 %vm357_vm1, %v939_v14 }
 0x780   :  { %1316 = vmatmul.mubr.msk.f32.vlgmr.msra.gmra.mrb[6].mxu0 %vm357_vm1, %v940_v15 }
 0x781   :  { %1452 = vmatpush3.bf16.msra.mxu0 %v1449_v7 }
 0x782   :  { %1454 = vmatprep.subr.bf16.mxu0 %v1453_v17 }
 0x785   :  { %1456 = vmatpush3.bf16.msra.mxu0 %v1453_v17 }
 0x786   :  { %1458 = vmatprep.subr.bf16.mxu0 %v1457_v33 }
 0x789   :  { %1460 = vmatpush3.bf16.msra.mxu0 %v1457_v33 }
 0x78a   :  { %1462 = vmatprep.subr.bf16.mxu0 %v1461_v22 }
 0x78d   :  { %1464 = vmatpush3.bf16.msra.mxu0 %v1461_v22 }
 0x78e   :  { %1466 = vmatprep.subr.bf16.mxu0 %v1465_v25 }
 0x791   :  { %1468 = vmatpush3.bf16.msra.mxu0 %v1465_v25 }
 0x792   :  { %1470 = vmatprep.subr.bf16.mxu0 %v1469_v28 }
 0x795   :  { %1472 = vmatpush3.bf16.msra.mxu0 %v1469_v28 }
 0x796   :  { %1474 = vmatprep.subr.bf16.mxu0 %v1473_v36 }
 0x799   :  { %1476 = vmatpush3.bf16.msra.mxu0 %v1473_v36 }
 0x79a   :  { %1478 = vmatprep.subr.bf16.mxu0 %v1477_v46 }
 0x79d   :  { %1480 = vmatpush3.bf16.msra.mxu0 %v1477_v46 }
 0x7bb   :  { %v1289_v39 = vpop.f32.mrb[4].mxu0 }
 0x7bc   :  { %v649_v32 = vsel %vm1718_vm4, %v1289_v39, %v462_v38  ;;  %v639_v43 = vpop.f32.mrb[5].mxu0 }
 0x7bd   :  { %v648_v20 = vsel %vm1718_vm4, %v639_v43, %v461_v40  ;;  %v836_v44 = vsel %vm1730_vm7, %v1776_v41, %v649_v32 }
 0x7be   :  { %v835_v61 = vsel %vm1730_vm7, %v1778_v42, %v648_v20 }
 0x853   :  { %v1317_v16 = vpop.f32.mrb[6].mxu0 }
 0x854   :  { %v1023_v62 = vsel %vm1763_vm10, %v1317_v16, %v836_v44  ;;  %v1013_v47 = vpop.f32.mrb[7].mxu0 }
 0x855   :  { %v1022_v59 = vsel %vm1763_vm10, %v1013_v47, %v835_v61 }
 0x856   :  { %1350 = vmatprep.mubr.f32.mxu0 %v1022_v59 }
 0x857   :  { %1351 = vmatmul.mubr.f32.vlgmr.msra.gmra.mrb[8].mxu0 %v1023_v62 }
 0x92a   :  { %v1352_v41 = vpop.f32.mrb[8].mxu0 }
 0x92b   :  { %v1119_v42 = vadd.f32 %v1352_v41, %v1158_v60  ;;  %v1113_v48 = vpop.f32.mrb[9].mxu0 }
 0x92c   :  { %v1114_v49 = vadd.f32 %v1158_v60, %v1113_v48 }
 0x92d   :  { %1123 = vst [vmem:[#allocation7 + $0x8] sm:$0xff] %v1119_v42 }
 0x92e   :  { %1122 = vst [vmem:[#allocation7] sm:$0xff] %v1114_v49 }
 0x92f   :  { %1576 = shalt.err (!%p1573_p6)
}
 0x930   :  { %s1577_s4 = scalar_lea.hbm %s1837_s6, 256 }
 0x931   :  { %p1578_p7 = scmp.ne.s32.totalorder %s1837_s6, %s1577_s4  ;;  %p1581_p8 = scmp.lt.u32.totalorder %s1577_s4, %s1837_s6 }
 0x933   :  { %p1583_p9 = pnand %p1581_p8, %p1578_p7 }
 0x935   :  { %1586 = shalt.err (!%p1583_p9)
}
 0x936   :  { %1135 = dma.vmem_to_hbm [thread:$0]  %s1130_s9, 256, %s1837_s6, [#allocation4], %s1597_s1, %s1597_s1, %s1598_s21  }
 0x937   :  { %1591 = dma.done.wait [#allocation4], 256  }
 0x938   :  { %1592 = vsyncadd [#allocation4], 4294967040 }
 0x939   :  { %1139 = vsyncpa [#allocation3], 1 }
 0x93a   :  { %1140 = vsyncpa [#allocation6], 1 }
 0x93b   :  { %1141 = vsyncpa [#allocation4], 1 }

</bundles_post_ra>
